<compile_context>
chip_gen: v7x
topology: tpu7x:2x2x1
jax: 0.10.0
libtpu: 0.0.40
codegen_flags: <defaults>
</compile_context>

<pallas_src>
import functools

import jax
import jax.numpy as jnp
from jax import lax
from jax.experimental import pallas as pl
from jax.experimental.pallas import tpu as pltpu

# Less extreme than -finfo.max so future score-dtype changes can't overflow
# before the exp (exp of a huge negative still flushes to 0 either way).
_MASK_VALUE = -0.7 * float(jnp.finfo(jnp.float32).max)


def _vmem_limit(estimate_bytes):
    """Explicit scoped-VMEM limit when the working set exceeds the smallest
    per-generation default (v5e: 16 MiB).  None keeps the compiler default.
    NOTE: v7x has 64 MiB physical VMEM per TensorCore; big-DIM f32 configs
    that would need more should switch weights/activations to bf16."""
    need = int(estimate_bytes * 1.25) + (1 << 20)
    if need <= (16 << 20):
        return None
    return need


# ---------------------------------------------------------------------------
# Kernel 1: fused q/k/v projection.  x:(TN, DIM) @ W_qkv_t:(DIM, 3*DIM)
# ---------------------------------------------------------------------------
def _qkv_proj_kernel(x_ref, w_ref, q_ref, k_ref, v_ref, *, dim, scale):
    x = x_ref[...]                                    # (TN, DIM), input dtype
    # Single fused matmul against the resident (DIM, 3*DIM) weight.
    res = jnp.dot(x, w_ref[...], preferred_element_type=jnp.float32)
    # Fold the softmax scale into q so kernel 2 never scales the score tile.
    q_ref[...] = (res[:, :dim] * scale).astype(q_ref.dtype)
    k_ref[...] = res[:, dim:2 * dim].astype(k_ref.dtype)
    v_ref[...] = res[:, 2 * dim:].astype(v_ref.dtype)


def _qkv_projection(x, w_qkv_t, *, block_n, scale):
    B, N, DIM = x.shape
    out = jax.ShapeDtypeStruct((B, N, DIM), x.dtype)
    x_spec = pl.BlockSpec((None, block_n, DIM), lambda b, n: (b, n, 0))
    # Constant index -> fused weight stays resident across the whole grid.
    w_spec = pl.BlockSpec((DIM, 3 * DIM), lambda b, n: (0, 0))

    est = (2 * block_n * DIM * x.dtype.itemsize            # x (double-buffered)
           + 2 * DIM * 3 * DIM * w_qkv_t.dtype.itemsize    # fused weight
           + 2 * 3 * block_n * DIM * x.dtype.itemsize)     # q/k/v outputs
    return pl.pallas_call(
        functools.partial(_qkv_proj_kernel, dim=DIM, scale=scale),
        out_shape=(out, out, out),
        grid_spec=pltpu.PrefetchScalarGridSpec(
            num_scalar_prefetch=0,
            grid=(B, N // block_n),
            in_specs=[x_spec, w_spec],
            out_specs=(x_spec, x_spec, x_spec),
        ),
        compiler_params=pltpu.CompilerParams(
            dimension_semantics=("parallel", "parallel"),
            vmem_limit_bytes=_vmem_limit(est)),
    )(x, w_qkv_t)


# ---------------------------------------------------------------------------
# Kernel 2: causal flash attention with fused output projection.
# grid = (B, q_tiles, heads, kv_tiles)
# ---------------------------------------------------------------------------
def _flash_attn_kernel(q_ref, k_ref, v_ref, wo_ref, o_ref,
                       m_sc, l_sc, acc_sc, oacc_sc):
    qi = pl.program_id(1)
    h = pl.program_id(2)
    kvi = pl.program_id(3)
    n_heads = pl.num_programs(2)
    n_kv = pl.num_programs(3)

    # Per-(b, q-tile) output accumulator init (held across heads & kv tiles).
    @pl.when((h == 0) & (kvi == 0))
    def _():
        oacc_sc[...] = jnp.zeros(oacc_sc.shape, jnp.float32)

    # Per-(b, h, q-tile) online-softmax state init.
    @pl.when(kvi == 0)
    def _():
        m_sc[...] = jnp.full(m_sc.shape, -jnp.inf, jnp.float32)
        l_sc[...] = jnp.zeros(l_sc.shape, jnp.float32)
        acc_sc[...] = jnp.zeros(acc_sc.shape, jnp.float32)

    # block_q == block_kv => tiles are either fully below the diagonal
    # (kvi < qi, unmasked), the diagonal tile itself (kvi == qi, tile-local
    # triu mask), or fully above (kvi > qi): the latter do no compute and
    # issue no DMA (their K/V index_map is clamped to the diagonal block).
    below = kvi < qi
    diag = kvi == qi

    def process(apply_mask):
        qb = q_ref[...]                           # (TQ, d), already scaled
        kb = k_ref[...]                           # (TK, d)
        vb = v_ref[...]                           # (TK, d)
        # q @ k^T without materialising a transpose: contract the last dims.
        s = lax.dot_general(qb, kb, (((1,), (1,)), ((), ())),
                            preferred_element_type=jnp.float32)
        if apply_mask:
            # qi == kvi here, so the causal pattern is tile-local and static.
            row = lax.broadcasted_iota(jnp.int32, s.shape, 0)
            col = lax.broadcasted_iota(jnp.int32, s.shape, 1)
            s = jnp.where(col > row, _MASK_VALUE, s)
        m_prev = m_sc[...]
        m_new = jnp.maximum(m_prev, jnp.max(s, axis=-1, keepdims=True))
        alpha = jnp.exp(m_prev - m_new)
        p = jnp.exp(s - m_new)
        l_sc[...] = alpha * l_sc[...] + jnp.sum(p, axis=-1, keepdims=True)
        acc_sc[...] = alpha * acc_sc[...] + jnp.dot(
            p.astype(vb.dtype), vb, preferred_element_type=jnp.float32)
        m_sc[...] = m_new

    @pl.when(diag)
    def _():
        process(apply_mask=True)

    @pl.when(below)
    def _():
        process(apply_mask=False)

    # Finalize this head: normalize (EUP reciprocal) and project straight into
    # the lane-dense (TQ, DIM) accumulator: out = sum_h o_h @ Wo_t[h*d:(h+1)*d].
    @pl.when(kvi == n_kv - 1)
    def _():
        inv_l = pl.reciprocal(l_sc[...], approx=True)
        o_h = (acc_sc[...] * inv_l).astype(wo_ref.dtype)          # (TQ, d)
        oacc_sc[...] += jnp.dot(o_h, wo_ref[...],
                                preferred_element_type=jnp.float32)

    @pl.when((h == n_heads - 1) & (kvi == n_kv - 1))
    def _():
        o_ref[...] = oacc_sc[...].astype(o_ref.dtype)


def _flash_attention(q, k, v, wo_t, *, heads, block_q, block_kv, out_dtype):
    assert block_q == block_kv, "causal tile skipping assumes square tiles"
    DIM = wo_t.shape[1]
    d = DIM // heads

    if q.ndim == 3:
        # Head-sliced layout: q/k/v stay in their (B, N, DIM) projection
        # layout; the head is a lane-aligned last-dim block (d % 128 == 0).
        B, N, _ = q.shape
        q_spec = pl.BlockSpec((None, block_q, d),
                              lambda b, qi, h, kv: (b, qi, h))
        kv_spec = pl.BlockSpec(
            (None, block_kv, d),
            # Clamp to the diagonal: above-diagonal steps reuse the previous
            # block -> no DMA is issued for causally-skipped tiles.
            lambda b, qi, h, kv: (b, jnp.minimum(kv, qi), h))
    else:
        # Fallback layout (d < 128): q/k/v are (B, H, N, d).
        B, _, N, _ = q.shape
        q_spec = pl.BlockSpec((None, None, block_q, d),
                              lambda b, qi, h, kv: (b, h, qi, 0))
        kv_spec = pl.BlockSpec(
            (None, None, block_kv, d),
            lambda b, qi, h, kv: (b, h, jnp.minimum(kv, qi), 0))

    wo_spec = pl.BlockSpec((d, DIM), lambda b, qi, h, kv: (h, 0))
    o_spec = pl.BlockSpec((None, block_q, DIM), lambda b, qi, h, kv: (b, qi, 0))

    itm = q.dtype.itemsize
    est = (2 * block_q * d * itm                              # q
           + 2 * 2 * block_kv * d * itm                       # k, v
           + 2 * d * DIM * wo_t.dtype.itemsize                # wo slice
           + 2 * block_q * DIM * jnp.dtype(out_dtype).itemsize  # out
           + block_q * (2 + d + DIM) * 4)                     # f32 scratch

    return pl.pallas_call(
        _flash_attn_kernel,
        out_shape=jax.ShapeDtypeStruct((B, N, DIM), out_dtype),
        grid_spec=pltpu.PrefetchScalarGridSpec(
            num_scalar_prefetch=0,
            grid=(B, N // block_q, heads, N // block_kv),
            in_specs=[q_spec, kv_spec, kv_spec, wo_spec],
            out_specs=o_spec,
            scratch_shapes=[
                pltpu.VMEM((block_q, 1), jnp.float32),    # running max
                pltpu.VMEM((block_q, 1), jnp.float32),    # running denom
                pltpu.VMEM((block_q, d), jnp.float32),    # per-head acc
                pltpu.VMEM((block_q, DIM), jnp.float32),  # Wo-projected acc
            ]),
        compiler_params=pltpu.CompilerParams(
            dimension_semantics=("parallel", "parallel",
                                 "arbitrary", "arbitrary"),
            vmem_limit_bytes=_vmem_limit(est)),
    )(q, k, v, wo_t)


# ---------------------------------------------------------------------------
# Top-level forward
# ---------------------------------------------------------------------------
def attention_forward(x, wq_t, wk_t, wv_t, wo_t, *, heads,
                      block_q=None, block_proj=None):
    """x: (B, N, DIM); w*_t: (DIM, DIM) already transposed (out = x @ w_t)."""
    B, N, DIM = x.shape
    assert DIM % heads == 0, "dim must be divisible by heads"
    d = DIM // heads
    # 256-wide tiles feed the 256x256 bf16 MXU on v6e/v7x (still fine on
    # v5e's 128x128 MXU); short sequences clamp to N.  Pass block_q=128 for
    # v5e-specific tuning if desired.
    bq = min(N, block_q or 256)
    bn = min(N, block_proj or 256)
    assert N % bq == 0 and N % bn == 0, "N must be divisible by tile sizes"

    # One fused projection weight -> a single weight-push stream in kernel 1.
    # (In a real model, build this once at parameter-prep time, not per call.)
    w_qkv_t = jnp.concatenate([wq_t, wk_t, wv_t], axis=1)

    q, k, v = _qkv_projection(x, w_qkv_t, block_n=bn, scale=d ** (-0.5))

    if d % 128 == 0:
        # Heads are lane-aligned slices of the last dim: skip the
        # 'b n (h d) -> b h n d' HBM round-trip entirely.
        return _flash_attention(q, k, v, wo_t, heads=heads, block_q=bq,
                                block_kv=bq, out_dtype=x.dtype)

    # Fallback (d < 128): explicit head split by XLA (layout plumbing only).
    def split_heads(t):
        return t.reshape(B, N, heads, d).transpose(0, 2, 1, 3)

    return _flash_attention(split_heads(q), split_heads(k), split_heads(v),
                            wo_t, heads=heads, block_q=bq, block_kv=bq,
                            out_dtype=x.dtype)


def attention_reference(x, wq_t, wk_t, wv_t, wo_t, *, heads):
    """Pure-JAX reference mirroring the PyTorch forward (eval mode)."""
    B, N, DIM = x.shape
    d = DIM // heads
    q = x @ wq_t
    k = x @ wk_t
    v = x @ wv_t

    def split(t):  # b n (h d) -> b h n d
        return t.reshape(B, N, heads, d).transpose(0, 2, 1, 3)

    q, k, v = split(q), split(k), split(v)
    dots = jnp.einsum('bhid,bhjd->bhij', q, k) * (d ** -0.5)
    mask = jnp.triu(jnp.ones((N, N), dtype=bool), k=1)
    dots = jnp.where(mask, -jnp.finfo(dots.dtype).max, dots)
    attn = jax.nn.softmax(dots, axis=-1)
    out = jnp.einsum('bhij,bhjd->bhid', attn, v)
    out = out.transpose(0, 2, 1, 3).reshape(B, N, DIM)
    return out @ wo_t


if __name__ == "__main__":
    def run_case(B, N, DIM, HEADS, seed=0):
        key = jax.random.PRNGKey(seed)
        kx, kq, kk, kv_, ko = jax.random.split(key, 5)
        x = jax.random.normal(kx, (B, N, DIM), dtype=jnp.float32)
        # nn.Linear(dim, dim, bias=False) weights are (dim, dim); pass transposes.
        bound = 1.0 / (DIM ** 0.5)
        wq_t = jax.random.uniform(kq, (DIM, DIM), jnp.float32, -bound, bound).T
        wk_t = jax.random.uniform(kk, (DIM, DIM), jnp.float32, -bound, bound).T
        wv_t = jax.random.uniform(kv_, (DIM, DIM), jnp.float32, -bound, bound).T
        wo_t = jax.random.uniform(ko, (DIM, DIM), jnp.float32, -bound, bound).T

        out = attention_forward(x, wq_t, wk_t, wv_t, wo_t, heads=HEADS)
        out = jax.block_until_ready(out)
        ref = attention_reference(x, wq_t, wk_t, wv_t, wo_t, heads=HEADS)
        assert out.shape == (B, N, DIM)
        assert jnp.allclose(out, ref, atol=5e-3, rtol=5e-3), (
            f"max abs diff {jnp.max(jnp.abs(out - ref))}")

    # Small case (d_head = 8 < 128 -> fallback XLA head-split path).
    run_case(B=2, N=8, DIM=32, HEADS=4)
    # Lane-aligned heads (d_head = 128 -> no-transpose head-sliced path) with
    # multiple q/kv tiles, exercising the causal skip + clamped KV index map.
    run_case(B=2, N=512, DIM=256, HEADS=2)

    print("KERNEL_OK")
</pallas_src>

<mosaic_0001>
module attributes {stable_mosaic.version = 11 : i64} {
  func.func @_qkv_proj_kernel(%arg0: i32, %arg1: i32, %arg2: memref<1x8x32xf32, #tpu.memory_space<vmem>>, %arg3: memref<32x96xf32, #tpu.memory_space<vmem>>, %arg4: memref<1x8x32xf32, #tpu.memory_space<vmem>>, %arg5: memref<1x8x32xf32, #tpu.memory_space<vmem>>, %arg6: memref<1x8x32xf32, #tpu.memory_space<vmem>>) attributes {dimension_semantics = [#tpu.dimension_semantics<parallel>, #tpu.dimension_semantics<parallel>], iteration_bounds = array<i64: 2, 1>, scalar_prefetch = 0 : i64, scratch_operands = 0 : i64, tpu.core_type = #tpu.core_type<tc>, window_params = [{transform_indices = @transform_0, window_bounds = array<i64: 1, 8, 32>}, {pipeline_mode = #tpu.pipeline_mode<synchronous>, transform_indices = @transform_1, window_bounds = array<i64: 32, 96>}, {transform_indices = @transform_2, window_bounds = array<i64: 1, 8, 32>}, {transform_indices = @transform_3, window_bounds = array<i64: 1, 8, 32>}, {transform_indices = @transform_4, window_bounds = array<i64: 1, 8, 32>}]} {
    %c0 = arith.constant 0 : index
    %c0_0 = arith.constant 0 : index
    %c0_1 = arith.constant 0 : index
    %0 = vector.load %arg2[%c0, %c0_0, %c0_1] : memref<1x8x32xf32, #tpu.memory_space<vmem>>, vector<1x8x32xf32>
    %1 = vector.shape_cast %0 : vector<1x8x32xf32> to vector<8x32xf32>
    %c0_2 = arith.constant 0 : index
    %c0_3 = arith.constant 0 : index
    %2 = vector.load %arg3[%c0_2, %c0_3] : memref<32x96xf32, #tpu.memory_space<vmem>>, vector<32x96xf32>
    %cst = arith.constant dense<0.000000e+00> : vector<8x96xf32>
    %3 = tpu.matmul %1, %2, %cst {dimension_numbers = #tpu.dot_dimension_numbers<[1], [0], [0], [1], [0, 0, 1, 1], [], []>} : vector<8x32xf32>, vector<32x96xf32>, vector<8x96xf32> -> vector<8x96xf32>
    %4 = vector.extract_strided_slice %3 {offsets = [0, 0], sizes = [8, 32], strides = [1, 1]} : vector<8x96xf32> to vector<8x32xf32>
    %cst_4 = arith.constant 0.353553385 : f32
    %5 = vector.broadcast %cst_4 : f32 to vector<8x32xf32>
    %6 = arith.mulf %4, %5 : vector<8x32xf32>
    %c0_5 = arith.constant 0 : index
    %c0_6 = arith.constant 0 : index
    %c0_7 = arith.constant 0 : index
    %7 = vector.load %arg4[%c0_5, %c0_6, %c0_7] : memref<1x8x32xf32, #tpu.memory_space<vmem>>, vector<1x8x32xf32>
    %8 = vector.shape_cast %7 : vector<1x8x32xf32> to vector<8x32xf32>
    %9 = vector.shape_cast %6 : vector<8x32xf32> to vector<1x8x32xf32>
    tpu.vector_store %arg4[%c0_5, %c0_6, %c0_7], %9 {strides = array<i32>} : memref<1x8x32xf32, #tpu.memory_space<vmem>>, vector<1x8x32xf32>,
    %10 = vector.extract_strided_slice %3 {offsets = [0, 32], sizes = [8, 32], strides = [1, 1]} : vector<8x96xf32> to vector<8x32xf32>
    %c0_8 = arith.constant 0 : index
    %c0_9 = arith.constant 0 : index
    %c0_10 = arith.constant 0 : index
    %11 = vector.load %arg5[%c0_8, %c0_9, %c0_10] : memref<1x8x32xf32, #tpu.memory_space<vmem>>, vector<1x8x32xf32>
    %12 = vector.shape_cast %11 : vector<1x8x32xf32> to vector<8x32xf32>
    %13 = vector.shape_cast %10 : vector<8x32xf32> to vector<1x8x32xf32>
    tpu.vector_store %arg5[%c0_8, %c0_9, %c0_10], %13 {strides = array<i32>} : memref<1x8x32xf32, #tpu.memory_space<vmem>>, vector<1x8x32xf32>,
    %14 = vector.extract_strided_slice %3 {offsets = [0, 64], sizes = [8, 32], strides = [1, 1]} : vector<8x96xf32> to vector<8x32xf32>
    %c0_11 = arith.constant 0 : index
    %c0_12 = arith.constant 0 : index
    %c0_13 = arith.constant 0 : index
    %15 = vector.load %arg6[%c0_11, %c0_12, %c0_13] : memref<1x8x32xf32, #tpu.memory_space<vmem>>, vector<1x8x32xf32>
    %16 = vector.shape_cast %15 : vector<1x8x32xf32> to vector<8x32xf32>
    %17 = vector.shape_cast %14 : vector<8x32xf32> to vector<1x8x32xf32>
    tpu.vector_store %arg6[%c0_11, %c0_12, %c0_13], %17 {strides = array<i32>} : memref<1x8x32xf32, #tpu.memory_space<vmem>>, vector<1x8x32xf32>,
    return
  }
  func.func @transform_0(%arg0: i32, %arg1: i32) -> (i32, i32, i32) {
    %c0_i32 = arith.constant 0 : i32
    %c0_i32_0 = arith.constant 0 : i32
    return %arg0, %arg1, %c0_i32 : i32, i32, i32
  }
  func.func @transform_1(%arg0: i32, %arg1: i32) -> (i32, i32) {
    %c0_i32 = arith.constant 0 : i32
    %c0_i32_0 = arith.constant 0 : i32
    %c0_i32_1 = arith.constant 0 : i32
    return %c0_i32, %c0_i32_0 : i32, i32
  }
  func.func @transform_2(%arg0: i32, %arg1: i32) -> (i32, i32, i32) {
    %c0_i32 = arith.constant 0 : i32
    %c0_i32_0 = arith.constant 0 : i32
    return %arg0, %arg1, %c0_i32 : i32, i32, i32
  }
  func.func @transform_3(%arg0: i32, %arg1: i32) -> (i32, i32, i32) {
    %c0_i32 = arith.constant 0 : i32
    %c0_i32_0 = arith.constant 0 : i32
    return %arg0, %arg1, %c0_i32 : i32, i32, i32
  }
  func.func @transform_4(%arg0: i32, %arg1: i32) -> (i32, i32, i32) {
    %c0_i32 = arith.constant 0 : i32
    %c0_i32_0 = arith.constant 0 : i32
    return %arg0, %arg1, %c0_i32 : i32, i32, i32
  }
}

</mosaic_0001>

<bundles_post_ra>
// kernel: tpu_custom_call.1
= control target key start
LH: loop header
LB: loop body
LE: loop exit
PB: predicated region body
PF: predicated region fallthrough
CT: control target
= control target key end

     0   :  { %10 = vsyncpa [#allocation3], 0  ;;  %s1237_s0 = inlined_call_operand.hbm [shape: f32[2,8,32], index: 0, kind: input, shape index: {}]   ;;  %s1238_s1 = inlined_call_operand.hbm [shape: f32[32,96], index: 1, kind: input, shape index: {}]   ;;  %s1239_s2 = inlined_call_operand.hbm [shape: f32[2,8,32], index: 2, kind: output, shape index: {0}]   ;;  %s1240_s3 = inlined_call_operand.hbm [shape: f32[2,8,32], index: 3, kind: output, shape index: {1}]   ;;  %s1241_s4 = inlined_call_operand.hbm [shape: f32[2,8,32], index: 4, kind: output, shape index: {2}]  }
   0x1   :  { %12 = vsyncpa [#allocation3 + $0x1], 0 }
   0x2   :  { %13 = vsyncpa [#allocation6], 0 }
   0x3   :  { %14 = vsyncpa [#allocation4], 0 }
   0x4   :  { %16 = vsyncpa [#allocation4 + $0x1], 0 }
   0x5   :  { %17 = vsyncpa [#allocation9], 0 }
   0x6   :  { %19 = vsyncpa [#allocation9 + $0x1], 0  ;;  %s940_s15 = smov 0   ;;  %s942_s16 = smov 0  }
   0x7   :  { %s944_s17 = smov 0   ;;  %s946_s18 = smov 0  }
   0x8   :  { %s948_s19 = smov 0   ;;  %s950_s20 = smov 0  }
   0x9 LB: > { %s971_s21 = sadd.s32 4294967295, %s901_s20   ;;  %s564_s22 = sadd.s32 4294967294, %s901_s20   ;;  %s901_s20 = sphi %s950_s20, %s25_s20   ;;  %s897_s19 = sphi %s948_s19, %s1263_s19   ;;  %s893_s18 = sphi %s946_s18, %s1262_s18   ;;  %s889_s17 = sphi %s944_s17, %s1261_s17   ;;  %s885_s16 = sphi %s942_s16, %s1260_s16   ;;  %s881_s15 = sphi %s940_s15, %s1259_s15  }
   0xa   : > { %p59_p0 = scmp.ne.s32.totalorder %s885_s16, %s881_s15  ;;  %p1242_p1 = scmp.eq.s32.totalorder %s971_s21, 0 }
   0xb   : > { %p112_p3 = scmp.eq.s32.totalorder %s564_s22, 1  ;;  %p565_p5 = scmp.ge.s32.totalorder %s901_s20, 1 }
   0xc   : > { %p982_p4 = por %p1242_p1, %p59_p0  ;;  %p175_p7 = scmp.lt.s32.totalorder %s901_s20, 3 }
   0xd   : > { %p987_p6 = por %p112_p3, %p59_p0  ;;  %s903_s26 = smov [#allocation5]  }
   0xe   : > { %s1245_s23 = scalar_select %p982_p4, 1, 0 }
   0xf   : > { %s1246_s24 = scalar_select %p987_p6, 1, 0 }
  0x10   : > { %p992_p8 = pnand %p565_p5, %p175_p7  ;;  %s187_s27 = sshll.u32 %s903_s26, 4  ;;  %s188_s27 = int_to_ptr.vmem [resolvable:$true] %s187_s27 }
  0x11   : > { %s37_s29 = sadd.s32 1, %s897_s19  ;;  %s697_s6 = scalar_lea.hbm %s1238_s1, 512 }
  0x12   : > { %s1247_s25 = scalar_select %p992_p8, 1, 0 }
  0x13   : > { %p619_p9 = pneg %p992_p8  ;;  %p698_p12 = scmp.ne.s32.totalorder %s1238_s1, %s697_s6 }
  0x14   : > { %p704_p5 = scmp.lt.u32.totalorder %s697_s6, %s1238_s1 }
  0x15   : > { %p1001_p11 = pnand %p619_p9, %p1242_p1 }
  0x17   : > { %p699_p13 = pneg %p1001_p11 }
  0x19   : > { %p700_p0 = pnand %p699_p13, %p698_p12 }
  0x1b   : > { %p701_p3 = pneg %p700_p0 }
  0x1d   : > { %p706_p7 = pnand %p704_p5, %p701_p3 }
  0x1f   : > { %709 = shalt.err (!%p706_p7)
}
  0x20   : > { %s710_s11 = scalar_lea.vmem %s188_s27, 512  ;;  %p718_p2 = scmp.lt.s32.totalorder %s188_s27, %s188_s27 }
  0x21   : > { %p711_p9 = scmp.ne.s32.totalorder %s188_s27, %s710_s11  ;;  %p719_p6 = scmp.lt.s32.totalorder %s710_s11, %s710_s11 }
  0x23   : > { %p713_p10 = pnand %p711_p9, %p699_p13  ;;  %p720_p4 = por %p719_p6, %p718_p2 }
  0x25   : > { %p714_p1 = pneg %p713_p10 }
  0x27   : > { %p721_p8 = pnand %p720_p4, %p714_p1 }
  0x29   : > { %724 = shalt.err (!%p721_p8)
}
  0x2a   : > { %s904_s12 = smov 128   ;;  %s905_s13 = smov 8  }
  0x2b   : > { %622 = dma.hbm_to_vmem [thread:$0]  (!%p1001_p11), %s1238_s1, 512, %s188_s27, [#allocation6], %s904_s12, %s904_s12, %s905_s13  }
  0x2c   : > { %p39_p1 = scmp.ge.s32.totalorder %s37_s29, 2  ;;  %s46_s30 = sadd.s32 1, %s889_s17 }
  0x2d   : > { %p53_p2 = scmp.ne.s32.totalorder %s889_s17, %s885_s16  ;;  %p54_p4 = scmp.eq.s32.totalorder %s901_s20, 0 }
  0x2e   : > { %s1265_s29 = smov (%p39_p1, %s37_s29), 0  ;;  %p1250_p8 = scmp.eq.s32.totalorder %s971_s21, 1 }
  0x2f   : > { %p1028_p6 = por %p54_p4, %p53_p2  ;;  %s41_s28 = ssub.s32 %s897_s19, %s1265_s29 }
  0x30   : > { %p1034_p10 = por %p1250_p8, %p53_p2  ;;  %p638_p12 = scmp.lt.s32.totalorder %s901_s20, 2 }
  0x31   : > { %p44_p11 = scmp.eq.s32.totalorder %s41_s28, 0  ;;  %s201_s27 = sand.u32 1, %s889_s17  }
  0x32   : > { %s568_s7 = sshll.u32 %s201_s27, 3  ;;  %s569_s9 = sshll.u32 %s897_s19, 7 }
  0x33   : > { %s1043_s8 = scalar_select %p44_p11, %s889_s17, %s46_s30  }
  0x34   : > { %s1049_s12 = scalar_lea.hbm %s1237_s0, %s569_s9  ;;  %s205_s13 = scalar_lea.vmem [#allocation2], %s568_s7 }
  0x35   : > { %s213_s14 = sshll.u32 %s205_s13, 4  ;;  %p1055_p13 = pnand %p638_p12, %p1028_p6  ;;  %s1051_s14 = int_to_ptr.vmem [resolvable:$true] %s213_s14 }
  0x36   : > { %s202_s30 = scalar_lea.sflag [#allocation3], %s201_s27  ;;  %s725_s28 = scalar_lea.hbm %s1049_s12, 128 }
  0x37   : > { %p726_p0 = scmp.ne.s32.totalorder %s1049_s12, %s725_s28  ;;  %p727_p3 = pneg %p1055_p13 }
  0x38   : > { %s730_s10 = scalar_lea.hbm %s1237_s0, 256  ;;  %p731_p9 = scmp.lt.u32.totalorder %s1049_s12, %s1237_s0 }
  0x39   : > { %p728_p5 = pnand %p727_p3, %p726_p0  ;;  %p732_p1 = scmp.lt.u32.totalorder %s730_s10, %s725_s28 }
  0x3a   : > { %p734_p4 = scmp.lt.u32.totalorder %s725_s28, %s1049_s12 }
  0x3b   : > { %p729_p7 = pneg %p728_p5  ;;  %p733_p2 = por %p732_p1, %p731_p9 }
  0x3d   : > { %p735_p6 = por %p734_p4, %p733_p2 }
  0x3f   : > { %p736_p8 = pnand %p735_p6, %p729_p7 }
  0x41   : > { %739 = shalt.err (!%p736_p8)
}
  0x42   : > { %s740_s27 = scalar_lea.vmem %s1051_s14, 128  ;;  %s906_s13 = smov [#allocation2]  }
  0x43   : > { %p741_p12 = scmp.ne.s32.totalorder %s1051_s14, %s740_s27  ;;  %s745_s7 = sshll.u32 %s906_s13, 4  ;;  %s746_s7 = int_to_ptr.vmem [resolvable:$false] %s745_s7 }
  0x44   : > { %s747_s9 = scalar_lea.vmem %s746_s7, 256  ;;  %p748_p5 = scmp.lt.s32.totalorder %s1051_s14, %s746_s7 }
  0x45   : > { %p743_p11 = pnand %p741_p12, %p727_p3  ;;  %p749_p9 = scmp.lt.s32.totalorder %s747_s9, %s740_s27 }
  0x47   : > { %p744_p0 = pneg %p743_p11  ;;  %p750_p1 = por %p749_p9, %p748_p5 }
  0x49   : > { %p751_p2 = pnand %p750_p1, %p744_p0 }
  0x4b   : > { %754 = shalt.err (!%p751_p2)
}
  0x4c   : > { %626 = dma.hbm_to_vmem [thread:$0]  (!%p1055_p13), %s1049_s12, 128, %s1051_s14, %s202_s30  }
  0x4d   : > { %p1253_p7 = scmp.ne.s32.totalorder %s1247_s25, 0 }
  0x4e   : > { %s1087_s28 = sand.u32 (!%p1253_p7), 1, %s885_s16   ;;  %p1254_p3 = scmp.ne.s32.totalorder (!%p1253_p7), %s1245_s23, 0 }
  0x4f   : > { %222 = sbr.rel (%p1253_p7) target bundleno = 464 (0x1d0), region = 28  ;;  %s1090_s10 = sshll.u32 (!%p1253_p7), %s1087_s28, 3 }
  0x50   : > { %s225_s5 = scalar_lea.sflag (!%p1253_p7), [#allocation3], %s1087_s28  ;;  %s228_s11 = scalar_lea.vmem (!%p1253_p7), [#allocation2], %s1090_s10 }
  0x56   : > { %864 = dma.done.wait (%p1254_p3), %s225_s5, 128  }
  0x57   : > { %866 = vsyncadd (%p1254_p3), %s225_s5, 4294967168  ;;  %p1255_p13 = scmp.eq.s32.totalorder %s971_s21, 0 }
  0x59   : > { %868 = dma.done.wait (%p1255_p13), [#allocation6], 512   ;;  %p1256_p4 = pmov %p1255_p13 }
  0x5a   : > { %v907_v0 = vmov 0.0|0.0   ;;  %vm908_vm0 = vmmov 0   ;;  %v909_v1 = vmov 0.0   ;;  %v268_v2 = vld [vmem:[#allocation5] sm:$0xff]  ;;  %v269_v3 = vld [vmem:[#allocation5 + $0x8] sm:$0xff]  ;;  %v270_v4 = vld [vmem:[#allocation5 + $0x10] sm:$0xff] }
  0x5b   : > { %870 = vsyncadd (%p1256_p4), [#allocation6], 4294966784  ;;  %601 = vmatprep.subr.bf16.mxu0 %v907_v0  ;;  %598 = vmatprep.mubr.msk.f32.mxu0 %vm908_vm0, %v909_v1  ;;  %v602_v5 = vpack.c.bf16 %v269_v3, %v268_v2  ;;  %v271_v6 = vld [vmem:[#allocation5 + $0x18] sm:$0xff]  ;;  %vm272_vm1 = vcmask 261120   ;;  %s1104_s23 = sshll.u32 %s893_s18, 7  ;;  %s252_s25 = scalar_lea.vmem [#allocation7], %s1090_s10 }
  0x5c   : > { %v605_v7 = vpack.c.bf16 %v271_v6, %v270_v4  ;;  %v267_v8 = vld [vmem:[%s228_s11] sm:$0xff]  ;;  %s382_s12 = sshll.u32 %s252_s25, 4  ;;  %s910_s14 = smov 96   ;;  %s1113_s12 = int_to_ptr.vmem [resolvable:$true] %s382_s12 }
  0x5d   : > { %603 = vmatpush3.bf16.msra.mxu0 %v602_v5  ;;  %s1111_s27 = scalar_lea.hbm %s1239_s2, %s1104_s23  ;;  %s358_s18 = scalar_lea.sflag [#allocation4], %s1087_s28 }
  0x5e   : > { %604 = vmatprep.subr.bf16.mxu0 %v907_v0  ;;  %s755_s13 = scalar_lea.vmem %s1113_s12, 128  ;;  %s911_s7 = smov [#allocation7]  }
  0x5f   : > { %p756_p6 = scmp.ne.s32.totalorder %s1113_s12, %s755_s13  ;;  %s759_s9 = sshll.u32 %s911_s7, 4  ;;  %s760_s9 = int_to_ptr.vmem [resolvable:$false] %s759_s9 }
  0x60   : > { %s761_s5 = scalar_lea.vmem %s760_s9, 256  ;;  %p762_p11 = scmp.lt.s32.totalorder %s1113_s12, %s760_s9 }
  0x61   : > { %606 = vmatpush3.bf16.msra.mxu0 %v605_v7  ;;  %p757_p8 = pnand %p756_p6, %p1034_p10  ;;  %p763_p0 = scmp.lt.s32.totalorder %s761_s5, %s755_s13 }
  0x63   : > { %p758_p12 = pneg %p757_p8  ;;  %p764_p5 = por %p763_p0, %p762_p11 }
  0x64   : > { %599 = vmatmul.mubr.msk.f32.vlgmr.msra.gmra.mrb[0].mxu0 %vm272_vm1, %v267_v8 }
  0x65   : > { %p765_p9 = pnand %p764_p5, %p758_p12 }
 0x137   : > { %v342_v9 = vpop.f32.mrb[0].mxu0 }
 0x138   : > { %v346_v10 = vmul.f32 0.35355338, %v342_v9  ;;  %349 = vrot.lane.b32.xlu0 %v342_v9, %s910_s14  ;;  %v600_v11 = vpop.f32.mrb[1].mxu0 }
 0x13a   : > { %347 = vst.msk [vmem:[%s252_s25] sm:$0xff] %vm272_vm1, %v346_v10 }
 0x13b   : > { %768 = shalt.err (!%p765_p9)
}
 0x13c   : > { %s769_s28 = scalar_lea.hbm %s1111_s27, 128  ;;  %s773_s14 = scalar_lea.hbm %s1239_s2, 256 }
 0x13d   : > { %p770_p1 = scmp.ne.s32.totalorder %s1111_s27, %s769_s28  ;;  %p774_p3 = scmp.lt.u32.totalorder %s1111_s27, %s1239_s2 }
 0x13e   : > { %p775_p13 = scmp.lt.u32.totalorder %s773_s14, %s769_s28  ;;  %p777_p6 = scmp.lt.u32.totalorder %s769_s28, %s1111_s27 }
 0x13f   : > { %p771_p2 = pnand %p770_p1, %p1034_p10 }
 0x140   : > { %p776_p4 = por %p775_p13, %p774_p3 }
 0x141   : > { %p772_p7 = pneg %p771_p2 }
 0x142   : > { %p778_p8 = por %p777_p6, %p776_p4 }
 0x144   : > { %p779_p12 = pnand %p778_p8, %p772_p7 }
 0x146   : > { %782 = shalt.err (!%p779_p12)
}
 0x147   : > { %613 = dma.vmem_to_hbm [thread:$0]  (%p1034_p10), %s1113_s12, 128, %s1111_s27, %s358_s18  }
 0x148   : > { %s912_s13 = smov 64   ;;  %s362_s7 = sand.u32 1, %s971_s21  }
 0x149   : > { %353 = vrot.lane.b32.xlu0 %v342_v9, %s912_s13  ;;  %s259_s9 = scalar_lea.vmem [#allocation8], %s1090_s10  ;;  %s1144_s25 = scalar_lea.hbm %s1240_s3, %s1104_s23 }
 0x14a   : > { %s396_s5 = sshll.u32 %s259_s9, 4  ;;  %s266_s14 = scalar_lea.vmem [#allocation10], %s1090_s10  ;;  %s1146_s5 = int_to_ptr.vmem [resolvable:$true] %s396_s5 }
 0x14b   : > { %s1151_s26 = sshll.u32 %s266_s14, 4  ;;  %s1154_s21 = scalar_lea.sflag [#allocation9], %s362_s7  ;;  %s1185_s26 = int_to_ptr.vmem [resolvable:$true] %s1151_s26 }
 0x14c   : > { %s783_s12 = scalar_lea.vmem %s1146_s5, 128  ;;  %s913_s27 = smov [#allocation8]  }
 0x14d   : > { %p784_p11 = scmp.ne.s32.totalorder %s1146_s5, %s783_s12  ;;  %s787_s18 = sshll.u32 %s913_s27, 4  ;;  %s788_s18 = int_to_ptr.vmem [resolvable:$false] %s787_s18 }
 0x14e   : > { %s789_s30 = scalar_lea.vmem %s788_s18, 256  ;;  %p790_p9 = scmp.lt.s32.totalorder %s1146_s5, %s788_s18 }
 0x14f   : > { %p785_p0 = pnand %p784_p11, %p1034_p10  ;;  %p791_p1 = scmp.lt.s32.totalorder %s789_s30, %s783_s12 }
 0x151   : > { %p786_p5 = pneg %p785_p0  ;;  %p792_p2 = por %p791_p1, %p790_p9 }
 0x153   : > { %p793_p7 = pnand %p792_p2, %p786_p5 }
 0x1aa   : > { %v350_v12 = vpop.permute.xlu0 %349 }
 0x1ab   : > { %352 = vst.msk [vmem:[%s259_s9] sm:$0xff] %vm272_vm1, %v350_v12 }
 0x1ac   : > { %796 = shalt.err (!%p793_p7)
}
 0x1ad   : > { %s797_s13 = scalar_lea.hbm %s1144_s25, 128  ;;  %s801_s28 = scalar_lea.hbm %s1240_s3, 256 }
 0x1ae   : > { %p798_p3 = scmp.ne.s32.totalorder %s1144_s25, %s797_s13  ;;  %p802_p6 = scmp.lt.u32.totalorder %s1144_s25, %s1240_s3 }
 0x1af   : > { %p803_p8 = scmp.lt.u32.totalorder %s801_s28, %s797_s13  ;;  %p805_p11 = scmp.lt.u32.totalorder %s797_s13, %s1144_s25 }
 0x1b0   : > { %p799_p13 = pnand %p798_p3, %p1034_p10 }
 0x1b1   : > { %p804_p12 = por %p803_p8, %p802_p6 }
 0x1b2   : > { %p800_p4 = pneg %p799_p13 }
 0x1b3   : > { %p806_p0 = por %p805_p11, %p804_p12 }
 0x1b5   : > { %p807_p5 = pnand %p806_p0, %p800_p4 }
 0x1b7   : > { %810 = shalt.err (!%p807_p5)
}
 0x1b8   : > { %614 = dma.vmem_to_hbm [thread:$0]  (%p1034_p10), %s1146_s5, 128, %s1144_s25, %s1154_s21  }
 0x1b9   : > { %s1182_s30 = scalar_lea.hbm %s1241_s4, %s1104_s23  ;;  %s811_s13 = scalar_lea.vmem %s1185_s26, 128 }
 0x1ba   : > { %p812_p9 = scmp.ne.s32.totalorder %s1185_s26, %s811_s13  ;;  %s914_s5 = smov [#allocation10]  }
 0x1bb   : > { %v354_v13 = vpop.permute.xlu0 %353  ;;  %s815_s25 = sshll.u32 %s914_s5, 4  ;;  %s816_s25 = int_to_ptr.vmem [resolvable:$false] %s815_s25 }
 0x1bc   : > { %356 = vst.msk [vmem:[%s266_s14] sm:$0xff] %vm272_vm1, %v354_v13  ;;  %p813_p1 = pnand %p812_p9, %p1034_p10  ;;  %s817_s7 = scalar_lea.vmem %s816_s25, 256 }
 0x1bd   : > { %p818_p7 = scmp.lt.s32.totalorder %s1185_s26, %s816_s25  ;;  %p819_p3 = scmp.lt.s32.totalorder %s817_s7, %s811_s13 }
 0x1be   : > { %p814_p2 = pneg %p813_p1 }
 0x1bf   : > { %p820_p13 = por %p819_p3, %p818_p7 }
 0x1c1   : > { %p821_p4 = pnand %p820_p13, %p814_p2 }
 0x1c3   : > { %824 = shalt.err (!%p821_p4)
}
 0x1c4   : > { %s825_s10 = scalar_lea.hbm %s1182_s30, 128  ;;  %s829_s9 = scalar_lea.hbm %s1241_s4, 256 }
 0x1c5   : > { %p826_p6 = scmp.ne.s32.totalorder %s1182_s30, %s825_s10  ;;  %p830_p11 = scmp.lt.u32.totalorder %s1182_s30, %s1241_s4 }
 0x1c6   : > { %p831_p0 = scmp.lt.u32.totalorder %s829_s9, %s825_s10  ;;  %p833_p9 = scmp.lt.u32.totalorder %s825_s10, %s1182_s30 }
 0x1c7   : > { %p827_p8 = pnand %p826_p6, %p1034_p10 }
 0x1c8   : > { %p832_p5 = por %p831_p0, %p830_p11 }
 0x1c9   : > { %p828_p12 = pneg %p827_p8 }
 0x1ca   : > { %p834_p1 = por %p833_p9, %p832_p5 }
 0x1cc   : > { %p835_p2 = pnand %p834_p1, %p828_p12 }
 0x1ce   : > { %838 = shalt.err (!%p835_p2)
}
 0x1cf   : > { %615 = dma.vmem_to_hbm [thread:$0]  (%p1034_p10), %s1185_s26, 128, %s1182_s30, %s1154_s21  }
 0x1d0 PF: > { %s422_s27 = sand.u32 1, %s881_s15   ;;  %p1257_p7 = scmp.ne.s32.totalorder %s1246_s24, 0 }
 0x1d1   : > { %p1258_p3 = scmp.ge.s32.totalorder %s901_s20, 2  ;;  %s423_s12 = scalar_lea.sflag [#allocation4], %s422_s27 }
 0x1d3   : > { %p628_p13 = pnand %p1258_p3, %p1257_p7 }
 0x1d5   : > { %872 = dma.done.wait (!%p628_p13), %s423_s12, 128  }
 0x1d6   : > { %874 = vsyncadd (!%p628_p13), %s423_s12, 4294967168  ;;  %s431_s18 = sand.u32 1, %s564_s22  }
 0x1d7   : > { %s432_s13 = scalar_lea.sflag [#allocation9], %s431_s18 }
 0x1d8   : > { %876 = dma.done.wait (!%p628_p13), %s432_s13, 256  }
 0x1d9   : > { %878 = vsyncadd (!%p628_p13), %s432_s13, 4294967040  ;;  %s25_s20 = sadd.s32 1, %s901_s20   ;;  %s1259_s15 = smov %s885_s16 }
 0x1da   : > { %p22_p10 = scmp.ge.s32.totalorder %s25_s20, 4   ;;  %s1260_s16 = smov %s889_s17 }
 0x1db   : > { %s1261_s17 = smov %s1043_s8  ;;  %s1262_s18 = smov %s897_s19 }
 0x1dc   : > { %s1263_s19 = smov %s1265_s29  ;;  %24 = sbr.rel (!%p22_p10) target bundleno = 9 (0x9), region = 109 }
 0x1e3   :  { %446 = vsyncpa [#allocation3], 1 }
 0x1e4   :  { %448 = vsyncpa [#allocation3 + $0x1], 1 }
 0x1e5   :  { %449 = vsyncpa [#allocation6], 1 }
 0x1e6   :  { %450 = vsyncpa [#allocation4], 1 }
 0x1e7   :  { %452 = vsyncpa [#allocation4 + $0x1], 1 }
 0x1e8   :  { %453 = vsyncpa [#allocation9], 1 }
 0x1e9   :  { %455 = vsyncpa [#allocation9 + $0x1], 1 }

</bundles_post_ra>
